<compile_context>
chip_gen: v5e
topology: v5e:2x2
jax: 0.10.0
libtpu: 0.0.40
codegen_flags: <defaults>
</compile_context>

<pallas_src>
import jax
import jax.numpy as jnp
from jax.experimental import pallas as pl
from jax.experimental.pallas import tpu as pltpu


def mlp_kernel(x_ref, w1t_ref, b1_ref, w2_ref, b2_ref, out_ref):
    # Cast the streamed f32 x tile to the compute dtype in-kernel (no wrapper
    # HBM pass).  x tile: (TB, F_in).
    xb = x_ref[...].astype(w1t_ref.dtype)
    # linear1, transposed: (H, F_in) . (TB, F_in)^T -> (H, TB), f32 accumulate
    # on the MXU.  Contraction on the last dim of both operands (trans_b form).
    h = jax.lax.dot_general(
        w1t_ref[...], xb,
        dimension_numbers=(((1,), (1,)), ((), ())),
        preferred_element_type=jnp.float32)
    # bias + ReLU on the VPU in f32 (b1 is an (H, 1) column broadcast over TB).
    h = jnp.maximum(h + b1_ref[...], 0.0)
    # linear2 (H -> 1): VPU multiply + sublane reduce over H; keeps the MXU
    # slot free and yields a lane-dense (1, TB) row.
    o = jnp.sum(h * w2_ref[...], axis=0, keepdims=True)
    # b2 is an SMEM scalar.
    out_ref[...] = (o + b2_ref[0, 0]).astype(out_ref.dtype)


def net_forward(x, w1, b1, w2, b2, *, tb=4096, compute_dtype=jnp.bfloat16):
    """Fused Linear -> ReLU -> Linear forward.

    x: (B, F_in) f32, w1: (F_in, H), b1: (1, H), w2: (H, 1), b2: (1, 1).
    Returns (B, 1) f32.  The first matmul runs in `compute_dtype` (bf16 by
    default; use jnp.float32 for strict parity with the f32 PyTorch module).
    """
    B, f_in = x.shape
    H = w1.shape[1]

    def round_up(a, m):
        return ((a + m - 1) // m) * m

    # Batch tile: 128-aligned so the lane-dense (1, tb) output block is legal.
    b_blocks = round_up(B, 128)
    tb_eff = round_up(min(max(tb, 1), b_blocks), 128)
    # v7x megacore: prefer >= 2 grid steps when the batch is big enough.
    if tb_eff >= b_blocks and b_blocks >= 256:
        tb_eff = round_up(b_blocks // 2, 128)
    grid = (pl.cdiv(B, tb_eff),)

    # Weight-side prep only (H*F_in elements — negligible); x itself goes to
    # the kernel untouched: no cast / pad / reshape pass over the batch stream.
    w1t = w1.astype(compute_dtype).T            # (H, F_in): MXU LHS
    b1c = b1.reshape(H, 1).astype(jnp.float32)  # column layout for (H, TB) epilogue
    w2c = w2.reshape(H, 1).astype(jnp.float32)
    b2f = b2.reshape(1, 1).astype(jnp.float32)

    out = pl.pallas_call(
        mlp_kernel,
        out_shape=jax.ShapeDtypeStruct((1, B), jnp.float32),
        grid_spec=pltpu.PrefetchScalarGridSpec(
            num_scalar_prefetch=0,
            grid=grid,
            in_specs=[
                # x: pipelined over the batch grid axis (ragged tail masked).
                pl.BlockSpec((tb_eff, f_in), lambda i: (i, 0)),
                # w1^T / b1 / w2 columns: constant index_map -> resident in VMEM.
                pl.BlockSpec((H, f_in), lambda i: (0, 0)),
                pl.BlockSpec((H, 1), lambda i: (0, 0)),
                pl.BlockSpec((H, 1), lambda i: (0, 0)),
                # b2: single scalar in SMEM.
                pl.BlockSpec(memory_space=pltpu.MemorySpace.SMEM),
            ],
            # Lane-dense output slab: one (1, tb) row block per grid step.
            out_specs=pl.BlockSpec((1, tb_eff), lambda i: (0, i)),
        ),
        compiler_params=pltpu.CompilerParams(
            dimension_semantics=("parallel",)),
    )(x, w1t, b1c, w2c, b2f)

    # (1, B) -> (B, 1); same element order, tiny array.
    return out.reshape(B, 1)


def init_params(key, num_in, num_out):
    """Deterministic init mirroring nn.Linear (uniform +/- 1/sqrt(fan_in))."""
    k1, k2, k3, k4 = jax.random.split(key, 4)
    lim1 = 1.0 / jnp.sqrt(num_in)
    lim2 = 1.0 / jnp.sqrt(num_out)
    # Stored already transposed relative to PyTorch's (out, in) convention.
    w1 = jax.random.uniform(k1, (num_in, num_out), jnp.float32, -lim1, lim1)
    b1 = jax.random.uniform(k2, (1, num_out), jnp.float32, -lim1, lim1)
    w2 = jax.random.uniform(k3, (num_out, 1), jnp.float32, -lim2, lim2)
    b2 = jax.random.uniform(k4, (1, 1), jnp.float32, -lim2, lim2)
    return w1, b1, w2, b2


if __name__ == "__main__":
    key = jax.random.PRNGKey(0)
    # batch=300 with tb=128 exercises multiple grid steps (300 = 2*128 + 44)
    # plus the masked ragged-tail block — no wrapper-side padding involved.
    batch, num_in, num_out = 300, 32, 64

    kx, kp = jax.random.split(key)
    x = jax.random.normal(kx, (batch, num_in), jnp.float32)
    w1, b1, w2, b2 = init_params(kp, num_in, num_out)

    out = net_forward(x, w1, b1, w2, b2, tb=128)
    out = jax.block_until_ready(out)

    # Reference in plain JAX with the same bf16 cast on the first matmul.
    h_ref = jnp.dot(x.astype(jnp.bfloat16), w1.astype(jnp.bfloat16),
                    preferred_element_type=jnp.float32) + b1
    h_ref = jnp.maximum(h_ref, 0.0)
    ref = h_ref @ w2 + b2

    assert out.shape == (batch, 1)
    err = float(jnp.max(jnp.abs(out - ref)))
    assert jnp.allclose(out, ref, atol=1e-3, rtol=1e-3), err

    print("KERNEL_OK")
</pallas_src>

<mosaic_0001>
module attributes {stable_mosaic.version = 11 : i64} {
  func.func @mlp_kernel(%arg0: i32, %arg1: memref<128x32xf32, #tpu.memory_space<vmem>>, %arg2: memref<64x32xbf16, #tpu.memory_space<vmem>>, %arg3: memref<64x1xf32, #tpu.memory_space<vmem>>, %arg4: memref<64x1xf32, #tpu.memory_space<vmem>>, %arg5: memref<1x1xf32, #tpu.memory_space<smem>>, %arg6: memref<1x128xf32, #tpu.memory_space<vmem>>) attributes {dimension_semantics = [#tpu.dimension_semantics<parallel>], iteration_bounds = array<i64: 3>, scalar_prefetch = 0 : i64, scratch_operands = 0 : i64, tpu.core_type = #tpu.core_type<tc>, window_params = [{transform_indices = @transform_0, window_bounds = array<i64: 128, 32>}, {pipeline_mode = #tpu.pipeline_mode<synchronous>, transform_indices = @transform_1, window_bounds = array<i64: 64, 32>}, {pipeline_mode = #tpu.pipeline_mode<synchronous>, transform_indices = @transform_2, window_bounds = array<i64: 64, 1>}, {pipeline_mode = #tpu.pipeline_mode<synchronous>, transform_indices = @transform_3, window_bounds = array<i64: 64, 1>}, {transform_indices = @transform_4, window_bounds = array<i64: 1, 1>}, {transform_indices = @transform_5, window_bounds = array<i64: 1, 128>}]} {
    %c0 = arith.constant 0 : index
    %c0_0 = arith.constant 0 : index
    %0 = vector.load %arg1[%c0, %c0_0] : memref<128x32xf32, #tpu.memory_space<vmem>>, vector<128x32xf32>
    %1 = arith.truncf %0 : vector<128x32xf32> to vector<128x32xbf16>
    %c0_1 = arith.constant 0 : index
    %c0_2 = arith.constant 0 : index
    %2 = vector.load %arg2[%c0_1, %c0_2] : memref<64x32xbf16, #tpu.memory_space<vmem>>, vector<64x32xbf16>
    %cst = arith.constant dense<0.000000e+00> : vector<64x128xf32>
    %3 = tpu.matmul %2, %1, %cst {dimension_numbers = #tpu.dot_dimension_numbers<[1], [1], [0], [0], [0, 0, 1, 0], [], []>} : vector<64x32xbf16>, vector<128x32xbf16>, vector<64x128xf32> -> vector<64x128xf32>
    %c0_3 = arith.constant 0 : index
    %c0_4 = arith.constant 0 : index
    %4 = vector.load %arg3[%c0_3, %c0_4] : memref<64x1xf32, #tpu.memory_space<vmem>>, vector<64x1xf32>
    %5 = vector.broadcast %4 : vector<64x1xf32> to vector<64x128xf32>
    %6 = arith.addf %3, %5 : vector<64x128xf32>
    %cst_5 = arith.constant 0.000000e+00 : f32
    %7 = vector.broadcast %cst_5 : f32 to vector<64x128xf32>
    %8 = arith.maximumf %6, %7 : vector<64x128xf32>
    %c0_6 = arith.constant 0 : index
    %c0_7 = arith.constant 0 : index
    %9 = vector.load %arg4[%c0_6, %c0_7] : memref<64x1xf32, #tpu.memory_space<vmem>>, vector<64x1xf32>
    %10 = vector.broadcast %9 : vector<64x1xf32> to vector<64x128xf32>
    %11 = arith.mulf %8, %10 : vector<64x128xf32>
    %cst_8 = arith.constant dense<0.000000e+00> : vector<128xf32>
    %12 = vector.multi_reduction <add>, %11, %cst_8 [0] : vector<64x128xf32> to vector<128xf32>
    %13 = vector.shape_cast %12 : vector<128xf32> to vector<1x128xf32>
    %c0_9 = arith.constant 0 : index
    %c0_10 = arith.constant 0 : index
    %14 = memref.load %arg5[%c0_9, %c0_10] : memref<1x1xf32, #tpu.memory_space<smem>>
    %15 = vector.broadcast %14 : f32 to vector<1x128xf32>
    %16 = arith.addf %13, %15 : vector<1x128xf32>
    %c0_11 = arith.constant 0 : index
    %c0_12 = arith.constant 0 : index
    %17 = vector.load %arg6[%c0_11, %c0_12] : memref<1x128xf32, #tpu.memory_space<vmem>>, vector<1x128xf32>
    tpu.vector_store %arg6[%c0_11, %c0_12], %16 {strides = array<i32>} : memref<1x128xf32, #tpu.memory_space<vmem>>, vector<1x128xf32>,
    return
  }
  func.func @transform_0(%arg0: i32) -> (i32, i32) {
    %c0_i32 = arith.constant 0 : i32
    %c0_i32_0 = arith.constant 0 : i32
    return %arg0, %c0_i32 : i32, i32
  }
  func.func @transform_1(%arg0: i32) -> (i32, i32) {
    %c0_i32 = arith.constant 0 : i32
    %c0_i32_0 = arith.constant 0 : i32
    %c0_i32_1 = arith.constant 0 : i32
    return %c0_i32, %c0_i32_0 : i32, i32
  }
  func.func @transform_2(%arg0: i32) -> (i32, i32) {
    %c0_i32 = arith.constant 0 : i32
    %c0_i32_0 = arith.constant 0 : i32
    %c0_i32_1 = arith.constant 0 : i32
    return %c0_i32, %c0_i32_0 : i32, i32
  }
  func.func @transform_3(%arg0: i32) -> (i32, i32) {
    %c0_i32 = arith.constant 0 : i32
    %c0_i32_0 = arith.constant 0 : i32
    %c0_i32_1 = arith.constant 0 : i32
    return %c0_i32, %c0_i32_0 : i32, i32
  }
  func.func @transform_4(%arg0: i32) -> (i32, i32) {
    %c0_i32 = arith.constant 0 : i32
    %c0_i32_0 = arith.constant 0 : i32
    %c0_i32_1 = arith.constant 0 : i32
    return %c0_i32, %c0_i32_0 : i32, i32
  }
  func.func @transform_5(%arg0: i32) -> (i32, i32) {
    %c0_i32 = arith.constant 0 : i32
    %c0_i32_0 = arith.constant 0 : i32
    return %c0_i32, %arg0 : i32, i32
  }
}

</mosaic_0001>

<bundles_post_ra>
// kernel: tpu_custom_call.1
= control target key start
LH: loop header
LB: loop body
LE: loop exit
PB: predicated region body
PF: predicated region fallthrough
CT: control target
= control target key end

     0   :  { %s931_s0 = inlined_call_operand.vmem [shape: f32[300,32], index: 0, kind: input, shape index: {}]   ;;  %s932_s1 = inlined_call_operand.vmem [shape: bf16[64,32], index: 1, kind: input, shape index: {}]   ;;  %s933_s2 = inlined_call_operand.vmem [shape: f32[64,1], index: 2, kind: input, shape index: {}]   ;;  %s934_s3 = inlined_call_operand.vmem [shape: f32[64,1], index: 3, kind: input, shape index: {}]   ;;  %s935_s4 = inlined_call_operand.<no memory space> [shape: f32[1,1], index: 4, kind: input, shape index: {}]   ;;  %s936_s5 = inlined_call_operand.hbm [shape: f32[1,300], index: 5, kind: output, shape index: {}]  }
   0x1   :  { %10 = sst [smem:[#allocation2]] %s935_s4 }
   0x2   :  { %11 = vsyncpa [#allocation4], 0 }
   0x3   :  { %13 = vsyncpa [#allocation4 + $0x1], 0  ;;  %s757_s20 = smov 0   ;;  %s759_s21 = smov 0  }
   0x4   :  { %s761_s22 = smov 0   ;;  %s763_s23 = smov 0  }
   0x5 LB: > { %s778_s4 = sadd.s32 4294967295, %s721_s23   ;;  %s560_s24 = sadd.s32 4294967294, %s721_s23   ;;  %s721_s23 = sphi %s763_s23, %s942_s23   ;;  %s717_s22 = sphi %s761_s22, %s941_s22   ;;  %s713_s21 = sphi %s759_s21, %s940_s21   ;;  %s709_s20 = sphi %s757_s20, %s939_s20  }
   0x6   : > { %s782_s25 = sadd.s32 1, %s721_s23   ;;  %s136_s26 = sadd.s32 1, %s717_s22 }
   0x7   : > { %s133_s27 = ssub.s32 %s721_s23, %s782_s25  ;;  %p146_p0 = scmp.ne.s32.totalorder %s717_s22, %s713_s21 }
   0x8   : > { %p134_p1 = scmp.eq.s32.totalorder %s133_s27, 0  ;;  %p147_p2 = scmp.eq.s32.totalorder %s778_s4, 2 }
   0x9   : > { %p152_p3 = scmp.ne.s32.totalorder %s713_s21, %s709_s20  ;;  %p153_p4 = scmp.eq.s32.totalorder %s560_s24, 2 }
   0xa   : > { %s793_s28 = scalar_select %p134_p1, %s717_s22, %s136_s26  }
   0xb   : > { %p795_p5 = por %p147_p2, %p146_p0  ;;  %p799_p6 = por %p153_p4, %p152_p3 }
   0xc   : > { %p563_p7 = scmp.ge.s32.totalorder %s721_s23, 1  ;;  %p200_p8 = scmp.lt.s32.totalorder %s721_s23, 4 }
   0xe   : > { %p201_p9 = pnand %p563_p7, %p200_p8 }
   0xf   : > { %s564_s6 = sshll.u32 (!%p201_p9), %s778_s4, 4  ;;  %s488_s18 = sld [smem:[#allocation2]] (!%p201_p9) }
  0x10   : > { %204 = sbr.rel (%p201_p9) target bundleno = 262 (0x106), region = 40  ;;  %p236_p10 = scmp.lt.s32.totalorder (!%p201_p9), %s564_s6, 37 }
  0x11   : > { %s229_s19 = sand.u32 (!%p201_p9), 1, %s713_s21   ;;  %s501_s27 = scalar_lea.hbm (!%p201_p9), %s936_s5, %s778_s4 }
  0x12   : > { %s505_s8 = sshll.u32 (!%p201_p9), %s501_s27, 4  ;;  %s493_s9 = scalar_lea.sflag (!%p201_p9), [#allocation4], %s229_s19  ;;  %s506_s8 = int_to_ptr.hbm [resolvable:$true] %s505_s8 }
  0x13   : > { %s679_s12 = scalar_lea.hbm (!%p201_p9), %s936_s5, 3 }
  0x15   : > { %v277_v0 = vld [vmem:[%s933_s2] sm:$0xff]  ;;  %v723_v1 = vmov 0   ;;  %s944_s6 = smov (!%p236_p10, %s564_s6), 37  ;;  %v279_v2 = vld [vmem:[%s933_s2 + $0x10] sm:$0xff]  ;;  %vm345_vm0 = vcmask 261120   ;;  %v278_v5 = vld [vmem:[%s933_s2 + $0x8] sm:$0xff] }
  0x16   : > { %656 = vset.pattern.permute.xlu0 %v723_v1  ;;  %657 = vset.pattern.permute.xlu1 %v723_v1  ;;  %s565_s11 = sshll.u32 %s944_s6, 3  ;;  %v280_v11 = vld [vmem:[%s933_s2 + $0x18] sm:$0xff]  ;;  %v420_v12 = vld [vmem:[%s934_s3 + $0x8] sm:$0xff]  ;;  %v421_v17 = vld [vmem:[%s934_s3 + $0x10] sm:$0xff]  ;;  %s230_s6 = scalar_lea.vmem [#allocation3], %s229_s19 }
  0x17   : > { %287 = vperm.xlu0 %656, %v277_v0   ;;  %658 = vset.pattern.permute.xlu2 %v723_v1  ;;  %s815_s14 = scalar_lea.vmem %s931_s0, %s565_s11  ;;  %v422_v18 = vld [vmem:[%s934_s3 + $0x18] sm:$0xff]  ;;  %v283_v23 = vld [vmem:[%s933_s2 + $0x30] sm:$0xff]  ;;  %v281_v24 = vld [vmem:[%s933_s2 + $0x20] sm:$0xff]  ;;  %s503_s7 = sshll.u32 %s230_s6, 4  ;;  %s504_s7 = int_to_ptr.vmem [resolvable:$true] %s503_s7 }
  0x18   : > { %297 = vperm.xlu1 %657, %v279_v2   ;;  %v259_v3 = vld [vmem:[%s815_s14 + $0x70] sm:$0xff]  ;;  %v260_v4 = vld [vmem:[%s815_s14 + $0x78] sm:$0xff]  ;;  %v257_v7 = vld [vmem:[%s815_s14 + $0x60] sm:$0xff]  ;;  %307 = vperm.xlu2 %658, %v281_v24  }
  0x19   : > { %v268_v6 = vpack.c.bf16 %v260_v4, %v259_v3  ;;  %v258_v8 = vld [vmem:[%s815_s14 + $0x68] sm:$0xff]  ;;  %v255_v14 = vld [vmem:[%s815_s14 + $0x50] sm:$0xff]  ;;  %v256_v15 = vld [vmem:[%s815_s14 + $0x58] sm:$0xff] }
  0x1a   : > { %v267_v10 = vpack.c.bf16 %v258_v8, %v257_v7  ;;  %v266_v16 = vpack.c.bf16 %v256_v15, %v255_v14  ;;  %v253_v20 = vld [vmem:[%s815_s14 + $0x40] sm:$0xff]  ;;  %v254_v21 = vld [vmem:[%s815_s14 + $0x48] sm:$0xff]  ;;  %v284_v25 = vld [vmem:[%s933_s2 + $0x38] sm:$0xff] }
  0x1b   : > { %v380_v9 = vsel %vm345_vm0, %v268_v6, 0  ;;  %v265_v22 = vpack.c.bf16 %v254_v21, %v253_v20  ;;  %v251_v27 = vld [vmem:[%s815_s14 + $0x30] sm:$0xff]  ;;  %v252_v28 = vld [vmem:[%s815_s14 + $0x38] sm:$0xff]  ;;  %v424_v30 = vld [vmem:[%s934_s3 + $0x28] sm:$0xff] }
  0x1c   : > { %382 = vmatpush.bf16.xpose.msra.mxu0 %v380_v9  ;;  %592 = vmatpush.bf16.xpose.msra.mxu1 %v380_v9  ;;  %v377_v13 = vsel %vm345_vm0, %v267_v10, 0  ;;  %v374_v19 = vsel %vm345_vm0, %v266_v16, 0  ;;  %v264_v29 = vpack.c.bf16 %v252_v28, %v251_v27  ;;  %v426_v31 = vld [vmem:[%s934_s3 + $0x38] sm:$0xff]  ;;  %v249_v33 = vld [vmem:[%s815_s14 + $0x20] sm:$0xff]  ;;  %v250_v34 = vld [vmem:[%s815_s14 + $0x28] sm:$0xff] }
  0x1d   : > { %593 = vmatpush.bf16.xpose.msra.mxu2 %v380_v9  ;;  %594 = vmatpush.bf16.xpose.msra.mxu3 %v380_v9  ;;  %v371_v26 = vsel %vm345_vm0, %v265_v22, 0  ;;  %v419_v35 = vld [vmem:[%s934_s3] sm:$0xff]  ;;  %v263_v36 = vpack.c.bf16 %v250_v34, %v249_v33  ;;  %v247_v38 = vld [vmem:[%s815_s14 + $0x10] sm:$0xff]  ;;  %v248_v39 = vld [vmem:[%s815_s14 + $0x18] sm:$0xff] }
  0x1e   : > { %v368_v32 = vsel %vm345_vm0, %v264_v29, 0  ;;  %v282_v40 = vld [vmem:[%s933_s2 + $0x28] sm:$0xff]  ;;  %v262_v41 = vpack.c.bf16 %v248_v39, %v247_v38  ;;  %v245_v43 = vld [vmem:[%s815_s14] sm:$0xff]  ;;  %v425_v48 = vld [vmem:[%s934_s3 + $0x30] sm:$0xff] }
  0x1f   : > { %292 = vperm.xlu0 %656, %v278_v5   ;;  %v365_v37 = vsel %vm345_vm0, %v263_v36, 0  ;;  %v246_v44 = vld [vmem:[%s815_s14 + $0x8] sm:$0xff]  ;;  %v423_v45 = vld [vmem:[%s934_s3 + $0x20] sm:$0xff]  ;;  %v590_v51 = vld [vmem:[%s932_s1 + $0x10] sm:$0xff]  ;;  %s673_s14 = sshra.s32 %s506_s8, 4  ;;  %s674_s14 = int_to_ptr.hbm [resolvable:$true] %s673_s14 }
  0x20   : > { %302 = vperm.xlu1 %657, %v280_v11   ;;  %429 = vperm.xlu2 %658, %v419_v35   ;;  %v362_v42 = vsel %vm345_vm0, %v262_v41, 0  ;;  %v261_v46 = vpack.c.bf16 %v246_v44, %v245_v43  ;;  %v588_v49 = vld [vmem:[%s932_s1] sm:$0xff]  ;;  %v589_v50 = vld [vmem:[%s932_s1 + $0x8] sm:$0xff]  ;;  %v591_v52 = vld [vmem:[%s932_s1 + $0x18] sm:$0xff]  ;;  %s675_s10 = scalar_lea.hbm %s674_s14, 1  ;;  %p680_p0 = scmp.lt.s32.totalorder %s674_s14, %s936_s5 }
  0x21   : > { %p676_p11 = scmp.ne.s32.totalorder %s674_s14, %s675_s10  ;;  %p681_p1 = scmp.lt.s32.totalorder %s679_s12, %s675_s10 }
  0x22   : > { %v359_v47 = vsel %vm345_vm0, %v261_v46, 0 }
  0x23   : > { %p677_p12 = pnand %p676_p11, %p795_p5  ;;  %p682_p2 = por %p681_p1, %p680_p0 }
  0x24   : > { %383 = vmatpush.bf16.xpose.msra.mxu0 %v377_v13  ;;  %595 = vmatpush.bf16.xpose.msra.mxu1 %v377_v13 }
  0x25   : > { %596 = vmatpush.bf16.xpose.msra.mxu2 %v377_v13  ;;  %597 = vmatpush.bf16.xpose.msra.mxu3 %v377_v13  ;;  %p678_p13 = pneg %p677_p12 }
  0x27   : > { %434 = vperm.xlu0 %656, %v420_v12   ;;  %p683_p3 = pnand %p682_p2, %p678_p13 }
  0x28   : > { %439 = vperm.xlu1 %657, %v421_v17   ;;  %312 = vperm.xlu2 %658, %v282_v40  }
  0x2c   : > { %384 = vmatpush.bf16.xpose.msra.mxu0 %v374_v19  ;;  %598 = vmatpush.bf16.xpose.msra.mxu1 %v374_v19 }
  0x2d   : > { %599 = vmatpush.bf16.xpose.msra.mxu2 %v374_v19  ;;  %600 = vmatpush.bf16.xpose.msra.mxu3 %v374_v19 }
  0x2f   : > { %444 = vperm.xlu0 %656, %v422_v18  }
  0x30   : > { %317 = vperm.xlu1 %657, %v283_v23   ;;  %449 = vperm.xlu2 %658, %v423_v45  }
  0x34   : > { %385 = vmatpush.bf16.xpose.msra.mxu0 %v371_v26  ;;  %601 = vmatpush.bf16.xpose.msra.mxu1 %v371_v26 }
  0x35   : > { %602 = vmatpush.bf16.xpose.msra.mxu2 %v371_v26  ;;  %603 = vmatpush.bf16.xpose.msra.mxu3 %v371_v26 }
  0x37   : > { %322 = vperm.xlu0 %656, %v284_v25  }
  0x38   : > { %454 = vperm.xlu1 %657, %v424_v30   ;;  %459 = vperm.xlu2 %658, %v425_v48  }
  0x3c   : > { %386 = vmatpush.bf16.xpose.msra.mxu0 %v368_v32  ;;  %604 = vmatpush.bf16.xpose.msra.mxu1 %v368_v32 }
  0x3d   : > { %605 = vmatpush.bf16.xpose.msra.mxu2 %v368_v32  ;;  %606 = vmatpush.bf16.xpose.msra.mxu3 %v368_v32 }
  0x3f   : > { %464 = vperm.xlu0 %656, %v426_v31  }
  0x44   : > { %387 = vmatpush.bf16.xpose.msra.mxu0 %v365_v37  ;;  %607 = vmatpush.bf16.xpose.msra.mxu1 %v365_v37 }
  0x45   : > { %608 = vmatpush.bf16.xpose.msra.mxu2 %v365_v37  ;;  %609 = vmatpush.bf16.xpose.msra.mxu3 %v365_v37 }
  0x4c   : > { %388 = vmatpush.bf16.xpose.msra.mxu0 %v362_v42  ;;  %610 = vmatpush.bf16.xpose.msra.mxu1 %v362_v42 }
  0x4d   : > { %611 = vmatpush.bf16.xpose.msra.mxu2 %v362_v42  ;;  %612 = vmatpush.bf16.xpose.msra.mxu3 %v362_v42 }
  0x54   : > { %389 = vmatpush.bf16.xpose.msra.mxu0 %v359_v47  ;;  %613 = vmatpush.bf16.xpose.msra.mxu1 %v359_v47 }
  0x55   : > { %614 = vmatpush.bf16.xpose.msra.mxu2 %v359_v47  ;;  %615 = vmatpush.bf16.xpose.msra.mxu3 %v359_v47 }
  0x5b   : > { %582 = vmatmul.msk.bf16.vlgmr.msra.gmra.mxu0 %vm345_vm0, %v588_v49  ;;  %583 = vmatmul.msk.bf16.vlgmr.msra.gmra.mxu1 %vm345_vm0, %v589_v50  ;;  %v489_v49 = vstv %s488_s18 }
  0x5c   : > { %584 = vmatmul.msk.bf16.vlgmr.msra.gmra.mxu2 %vm345_vm0, %v590_v51  ;;  %585 = vmatmul.msk.bf16.vlgmr.msra.gmra.mxu3 %vm345_vm0, %v591_v52 }
  0x72   : > { %v308_v55 = vpop.permute.xlu2 %307 }
  0x7a   : > { %v430_v58 = vpop.permute.xlu2 %429 }
  0x82   : > { %v313_v63 = vpop.permute.xlu2 %312 }
  0x89   : > { %v288_v53 = vpop.permute.xlu0 %287 }
  0x8a   : > { %v298_v54 = vpop.permute.xlu1 %297  ;;  %v450_v14 = vpop.permute.xlu2 %449 }
  0x91   : > { %v293_v56 = vpop.permute.xlu0 %292 }
  0x92   : > { %v303_v57 = vpop.permute.xlu1 %302  ;;  %v460_v37 = vpop.permute.xlu2 %459 }
  0x99   : > { %v435_v59 = vpop.permute.xlu0 %434 }
  0x9a   : > { %v440_v60 = vpop.permute.xlu1 %439 }
  0xa1   : > { %v445_v0 = vpop.permute.xlu0 %444 }
  0xa2   : > { %v318_v10 = vpop.permute.xlu1 %317 }
  0xa9   : > { %v323_v18 = vpop.permute.xlu0 %322 }
  0xaa   : > { %v455_v33 = vpop.permute.xlu1 %454 }
  0xb1   : > { %v465_v40 = vpop.permute.xlu0 %464 }
  0xd8   : > { %v391_v61 = vpop.f32.mrf.mxu0  ;;  %v396_v62 = vpop.f32.mrf.mxu1 }
  0xd9   : > { %v392_v1 = vadd.f32 %v391_v61, %v288_v53  ;;  %v397_v2 = vadd.f32 %v396_v62, %v298_v54 }
  0xdb   : > { %v411_v7 = vmax.f32 %v392_v1, 0.0  ;;  %v413_v11 = vmax.f32 %v397_v2, 0.0 }
  0xdd   : > { %v467_v15 = vmul.f32 %v430_v58, %v411_v7  ;;  %v469_v19 = vmul.f32 %v440_v60, %v413_v11 }
  0xdf   : > { %v401_v3 = vpop.f32.mrf.mxu2  ;;  %v406_v4 = vpop.f32.mrf.mxu3 }
  0xe0   : > { %v393_v5 = vpop.f32.mrf.mxu0  ;;  %v398_v6 = vpop.f32.mrf.mxu1  ;;  %v402_v12 = vadd.f32 %v401_v3, %v308_v55  ;;  %v407_v21 = vadd.f32 %v406_v4, %v318_v10 }
  0xe1   : > { %v394_v8 = vadd.f32 %v393_v5, %v293_v56  ;;  %v399_v9 = vadd.f32 %v398_v6, %v303_v57 }
  0xe2   : > { %v415_v20 = vmax.f32 %v402_v12, 0.0  ;;  %v417_v31 = vmax.f32 %v407_v21, 0.0 }
  0xe3   : > { %v412_v13 = vmax.f32 %v394_v8, 0.0  ;;  %v414_v17 = vmax.f32 %v399_v9, 0.0 }
  0xe4   : > { %v471_v30 = vmul.f32 %v450_v14, %v415_v20  ;;  %v473_v38 = vmul.f32 %v460_v37, %v417_v31 }
  0xe5   : > { %v468_v16 = vmul.f32 %v435_v59, %v412_v13  ;;  %v470_v26 = vmul.f32 %v445_v0, %v414_v17 }
  0xe7   : > { %v475_v22 = vadd.f32 %v468_v16, %v467_v15  ;;  %v403_v23 = vpop.f32.mrf.mxu2  ;;  %v408_v24 = vpop.f32.mrf.mxu3 }
  0xe8   : > { %v404_v25 = vadd.f32 %v403_v23, %v313_v63  ;;  %v409_v28 = vadd.f32 %v408_v24, %v323_v18 }
  0xe9   : > { %v476_v27 = vadd.f32 %v475_v22, %v469_v19 }
  0xea   : > { %v416_v29 = vmax.f32 %v404_v25, 0.0  ;;  %v418_v36 = vmax.f32 %v409_v28, 0.0 }
  0xeb   : > { %v477_v32 = vadd.f32 %v476_v27, %v470_v26 }
  0xec   : > { %v472_v34 = vmul.f32 %v455_v33, %v416_v29  ;;  %v474_v41 = vmul.f32 %v465_v40, %v418_v36 }
  0xed   : > { %v478_v35 = vadd.f32 %v477_v32, %v471_v30 }
  0xef   : > { %v479_v39 = vadd.f32 %v478_v35, %v472_v34 }
  0xf1   : > { %v480_v42 = vadd.f32 %v479_v39, %v473_v38 }
  0xf3   : > { %v481_v43 = vadd.f32 %v480_v42, %v474_v41 }
  0xf5   : > { %v482_v44 = vrot.slane %v481_v43, 4 }
  0xf7   : > { %v483_v45 = vadd.f32 %v482_v44, %v481_v43 }
  0xf9   : > { %v484_v46 = vrot.slane %v483_v45, 2 }
  0xfb   : > { %v485_v47 = vadd.f32 %v484_v46, %v483_v45 }
  0xfd   : > { %v486_v48 = vrot.slane %v485_v47, 1 }
  0xff   : > { %v487_v50 = vadd.f32 %v486_v48, %v485_v47 }
 0x101   : > { %v490_v51 = vadd.f32 %v489_v49, %v487_v50 }
 0x103   : > { %491 = vst [vmem:[%s230_s6] sm:$0x1] %v490_v51 }
 0x104   : > { %686 = shalt.err (!%p683_p3)
}
 0x105   : > { %616 = dma.vmem_to_hbm [thread:$0]  (%p795_p5), %s504_s7, 16, %s506_s8, %s493_s9  }
 0x106 PF: > { %p622_p4 = scmp.ge.s32.totalorder %s721_s23, 2  ;;  %s517_s16 = sand.u32 1, %s709_s20  }
 0x107   : > { %s518_s17 = scalar_lea.sflag [#allocation4], %s517_s16 }
 0x108   : > { %p619_p7 = pnand %p622_p4, %p799_p6 }
 0x10a   : > { %p620_p8 = pneg %p619_p7 }
 0x10c   : > { %704 = dma.done.wait (%p620_p8), %s518_s17, 16  }
 0x10d   : > { %706 = vsyncadd (%p620_p8), %s518_s17, 4294967280  ;;  %p16_p9 = scmp.ge.s32.totalorder %s782_s25, 5   ;;  %s939_s20 = smov %s713_s21 }
 0x10e   : > { %s940_s21 = smov %s717_s22  ;;  %s941_s22 = smov %s793_s28 }
 0x10f   : > { %s942_s23 = smov %s782_s25  ;;  %18 = sbr.rel (!%p16_p9) target bundleno = 5 (0x5), region = 75 }
 0x114   :  { %523 = vsyncpa [#allocation4], 1 }
 0x115   :  { %525 = vsyncpa [#allocation4 + $0x1], 1 }

</bundles_post_ra>
